<compile_context>
chip_gen: v6e
topology: v6e:2x2x1
jax: 0.10.0
libtpu: 0.0.40
codegen_flags: <defaults>
</compile_context>

<pallas_src>
import jax
import jax.numpy as jnp
from jax import lax
from jax.experimental import pallas as pl
from jax.experimental.pallas import tpu as pltpu


# ----------------------------- Pallas kernels ---------------------------------

def _stats_kernel(x_ref, xxt_ref, sum_ref, xxt_acc, sum_acc):
    """Accumulate per-group row sums and the GxG Gram matrix for one batch element.

    x_ref  : (1, G, TM)  f32 block of the flattened activations
    xxt_ref: (1, G, G)   per-n partial Gram matrix output
    sum_ref: (1, G, 1)   per-n partial row-sum output
    xxt_acc/sum_acc: f32 VMEM accumulators (resident across the reduction axis)
    """
    j = pl.program_id(1)

    @pl.when(j == 0)
    def _():
        xxt_acc[...] = jnp.zeros_like(xxt_acc)
        sum_acc[...] = jnp.zeros_like(sum_acc)

    xb = x_ref[0]                                        # (G, TM)
    # A @ A^T with the contraction on the lane (last) dim of both operands.
    xxt_acc[...] += lax.dot_general(
        xb, xb,
        dimension_numbers=(((1,), (1,)), ((), ())),
        preferred_element_type=jnp.float32)
    sum_acc[...] += jnp.sum(xb, axis=-1, keepdims=True)  # XLU cross-lane reduce

    @pl.when(j == pl.num_programs(1) - 1)
    def _():
        xxt_ref[0] = xxt_acc[...]
        sum_ref[0] = sum_acc[...]


def _apply_kernel(wm_ref, x_ref, o_ref):
    """x_out = wm @ x for one lane-dense (G, TM) tile.

    wm_ref: (G, G) whitening matrix (broadcast to every grid point)
    x_ref : (1, G, TM)
    o_ref : (1, G, TM)
    """
    o_ref[0] = jnp.dot(wm_ref[...], x_ref[0],
                       preferred_element_type=jnp.float32).astype(o_ref.dtype)


# ------------------------------ pallas_call wrappers ---------------------------

def _pick_tile(m, cap=4096):
    """Largest multiple of 128 that divides m (m is already a multiple of 128), <= cap."""
    t = min(cap, m)
    t -= t % 128
    while m % t:
        t -= 128
    return t


def _group_stats(x3, tile_m):
    """x3: (N, G, Mp) f32.  Returns (xxT (G,G), row_sums (G,1)) summed over N and Mp."""
    n, g, mp = x3.shape
    xxt_p, sum_p = pl.pallas_call(
        _stats_kernel,
        out_shape=(jax.ShapeDtypeStruct((n, g, g), jnp.float32),
                   jax.ShapeDtypeStruct((n, g, 1), jnp.float32)),
        grid_spec=pltpu.PrefetchScalarGridSpec(
            num_scalar_prefetch=0,
            grid=(n, mp // tile_m),
            in_specs=[pl.BlockSpec((1, g, tile_m), lambda i, j: (i, 0, j))],
            out_specs=(pl.BlockSpec((1, g, g), lambda i, j: (i, 0, 0)),
                       pl.BlockSpec((1, g, 1), lambda i, j: (i, 0, 0))),
            scratch_shapes=[pltpu.VMEM((g, g), jnp.float32),
                            pltpu.VMEM((g, 1), jnp.float32)],
        ),
        compiler_params=pltpu.CompilerParams(
            dimension_semantics=("parallel", "arbitrary")),
    )(x3)
    # Tiny (N, G, G) / (N, G, 1) reduction over the batch axis in glue.
    return jnp.sum(xxt_p, axis=0), jnp.sum(sum_p, axis=0)


def _apply_wm(wm, x3, tile_m, out_dtype):
    """x3: (N, G, Mp);  returns wm @ x3[n] for every n, same shape."""
    n, g, mp = x3.shape
    return pl.pallas_call(
        _apply_kernel,
        out_shape=jax.ShapeDtypeStruct((n, g, mp), out_dtype),
        grid_spec=pltpu.PrefetchScalarGridSpec(
            num_scalar_prefetch=0,
            grid=(n, mp // tile_m),
            in_specs=[pl.BlockSpec((g, g), lambda i, j: (0, 0)),
                      pl.BlockSpec((1, g, tile_m), lambda i, j: (i, 0, j))],
            out_specs=pl.BlockSpec((1, g, tile_m), lambda i, j: (i, 0, j)),
        ),
        compiler_params=pltpu.CompilerParams(
            dimension_semantics=("parallel", "parallel")),
    )(wm.astype(jnp.float32), x3)


# --------------------------------- BD forward ----------------------------------

def bd_forward(x, running_wm, *, training=False, T=5, eps=1e-5, momentum=0.9,
               tile_cap=4096):
    """BD.forward.  x: (N, G, C, H, W).  Returns (x_out, new_running_wm).

    `T` is accepted for signature parity with the PyTorch module but is unused by the
    Cholesky-based whitening path (same as in the reference implementation).
    """
    del T
    n, g, c, h, w = x.shape
    chw = c * h * w
    m_true = n * chw

    x3 = x.reshape(n, g, chw).astype(jnp.float32)        # free reshape, no transpose
    pad = (-chw) % 128                                   # lane-dense tiles
    if pad:
        x3 = jnp.pad(x3, ((0, 0), (0, 0), (0, pad)))
    mp = chw + pad
    tile_m = _pick_tile(mp, tile_cap)

    if training:
        xxt, sums = _group_stats(x3, tile_m)
        eye = jnp.eye(g, dtype=jnp.float32)
        mean = sums / m_true                             # zero padding adds nothing to sums
        # one-pass identity: xc xc^T / m == x x^T / m - mean mean^T  (f32 accumulation)
        sigma = xxt / m_true - mean @ mean.T + eps * eye
        r_tr = 1.0 / jnp.sum(sigma * eye)                # 1 / trace(Sigma)
        sigma_n = sigma * r_tr
        # TODO(synk): the GxG (10x10) Cholesky + triangular solve is tiny, inherently
        # sequential scalar linear algebra with no useful MXU/VPU mapping -> jnp glue.
        chol = jnp.linalg.cholesky(sigma_n)
        wm = jax.scipy.linalg.solve_triangular(chol, eye, lower=True)
        new_running_wm = momentum * running_wm.astype(jnp.float32) + (1.0 - momentum) * wm
    else:
        wm = running_wm.astype(jnp.float32)
        new_running_wm = running_wm

    y3 = _apply_wm(wm, x3, tile_m, x.dtype)
    if pad:
        y3 = y3[..., :chw]
    return y3.reshape(n, g, c, h, w), new_running_wm


# ------------------------------ pure-JAX reference ------------------------------

def bd_reference(x, running_wm, *, training=False, eps=1e-5, momentum=0.9):
    n, g, c, h, w = x.shape
    x_in = jnp.transpose(x, (1, 0, 2, 3, 4)).reshape(g, -1).astype(jnp.float32)
    if training:
        mean = x_in.mean(-1, keepdims=True)
        xc = x_in - mean
        m = x_in.shape[1]
        eye = jnp.eye(g, dtype=jnp.float32)
        sigma = xc @ xc.T / m + eye * eps
        r_tr = 1.0 / jnp.sum(sigma * eye)
        sigma_n = sigma * r_tr
        chol = jnp.linalg.cholesky(sigma_n)
        wm = jax.scipy.linalg.solve_triangular(chol, eye, lower=True)
        new_rwm = momentum * running_wm.astype(jnp.float32) + (1.0 - momentum) * wm
    else:
        wm = running_wm.astype(jnp.float32)
        new_rwm = running_wm
    y = (wm @ x_in).reshape(g, n, c, h, w)
    return jnp.transpose(y, (1, 0, 2, 3, 4)).astype(x.dtype), new_rwm


# ------------------------------------ main --------------------------------------

if __name__ == "__main__":
    key = jax.random.PRNGKey(0)
    N, G, C, H, W = 2, 10, 4, 16, 16
    x = jax.random.uniform(key, (N, G, C, H, W), jnp.float32)
    running_wm = jnp.eye(G, dtype=jnp.float32)           # buffer init: torch.eye(G)

    # eval path: wm = running_wm (identity at init)
    y_eval, _ = bd_forward(x, running_wm, training=False)
    y_eval = jax.block_until_ready(y_eval)
    ref_eval, _ = bd_reference(x, running_wm, training=False)
    assert y_eval.shape == (N, G, C, H, W), y_eval.shape
    assert bool(jnp.all(jnp.isfinite(y_eval)))
    assert bool(jnp.allclose(y_eval, ref_eval, atol=1e-5, rtol=1e-5))

    # training path: whitening matrix from batch stats + running buffer update
    y_tr, rwm_new = bd_forward(x, running_wm, training=True)
    y_tr = jax.block_until_ready(y_tr)
    ref_tr, ref_rwm = bd_reference(x, running_wm, training=True)
    assert y_tr.shape == (N, G, C, H, W), y_tr.shape
    assert bool(jnp.all(jnp.isfinite(y_tr)))
    assert bool(jnp.allclose(y_tr, ref_tr, atol=1e-2, rtol=1e-2))
    assert bool(jnp.allclose(rwm_new, ref_rwm, atol=1e-2, rtol=1e-2))

    print("KERNEL_OK")
</pallas_src>

<mosaic_0001>
module attributes {stable_mosaic.version = 11 : i64} {
  func.func @_apply_kernel(%arg0: i32, %arg1: i32, %arg2: memref<10x10xf32, #tpu.memory_space<vmem>>, %arg3: memref<1x10x1024xf32, #tpu.memory_space<vmem>>, %arg4: memref<1x10x1024xf32, #tpu.memory_space<vmem>>) attributes {dimension_semantics = [#tpu.dimension_semantics<parallel>, #tpu.dimension_semantics<parallel>], iteration_bounds = array<i64: 2, 1>, scalar_prefetch = 0 : i64, scratch_operands = 0 : i64, tpu.core_type = #tpu.core_type<tc>, window_params = [{pipeline_mode = #tpu.pipeline_mode<synchronous>, transform_indices = @transform_0, window_bounds = array<i64: 10, 10>}, {transform_indices = @transform_1, window_bounds = array<i64: 1, 10, 1024>}, {transform_indices = @transform_2, window_bounds = array<i64: 1, 10, 1024>}]} {
    %c0 = arith.constant 0 : index
    %c0_0 = arith.constant 0 : index
    %0 = vector.load %arg2[%c0, %c0_0] : memref<10x10xf32, #tpu.memory_space<vmem>>, vector<10x10xf32>
    %c0_1 = arith.constant 0 : index
    %c0_2 = arith.constant 0 : index
    %c0_3 = arith.constant 0 : index
    %1 = vector.load %arg3[%c0_1, %c0_2, %c0_3] : memref<1x10x1024xf32, #tpu.memory_space<vmem>>, vector<1x10x1024xf32>
    %2 = vector.shape_cast %1 : vector<1x10x1024xf32> to vector<10x1024xf32>
    %cst = arith.constant dense<0.000000e+00> : vector<10x1024xf32>
    %3 = tpu.matmul %0, %2, %cst {dimension_numbers = #tpu.dot_dimension_numbers<[1], [0], [0], [1], [0, 0, 1, 1], [], []>} : vector<10x10xf32>, vector<10x1024xf32>, vector<10x1024xf32> -> vector<10x1024xf32>
    %c0_4 = arith.constant 0 : index
    %c0_5 = arith.constant 0 : index
    %c0_6 = arith.constant 0 : index
    %4 = vector.load %arg4[%c0_4, %c0_5, %c0_6] : memref<1x10x1024xf32, #tpu.memory_space<vmem>>, vector<1x10x1024xf32>
    %5 = vector.shape_cast %4 : vector<1x10x1024xf32> to vector<10x1024xf32>
    %6 = vector.shape_cast %3 : vector<10x1024xf32> to vector<1x10x1024xf32>
    tpu.vector_store %arg4[%c0_4, %c0_5, %c0_6], %6 {strides = array<i32>} : memref<1x10x1024xf32, #tpu.memory_space<vmem>>, vector<1x10x1024xf32>,
    return
  }
  func.func @transform_0(%arg0: i32, %arg1: i32) -> (i32, i32) {
    %c0_i32 = arith.constant 0 : i32
    %c0_i32_0 = arith.constant 0 : i32
    %c0_i32_1 = arith.constant 0 : i32
    return %c0_i32, %c0_i32_0 : i32, i32
  }
  func.func @transform_1(%arg0: i32, %arg1: i32) -> (i32, i32, i32) {
    %c0_i32 = arith.constant 0 : i32
    %c0_i32_0 = arith.constant 0 : i32
    return %arg0, %c0_i32, %arg1 : i32, i32, i32
  }
  func.func @transform_2(%arg0: i32, %arg1: i32) -> (i32, i32, i32) {
    %c0_i32 = arith.constant 0 : i32
    %c0_i32_0 = arith.constant 0 : i32
    return %arg0, %c0_i32, %arg1 : i32, i32, i32
  }
}

</mosaic_0001>

<bundles_post_ra>
// kernel: tpu_custom_call.1
= control target key start
LH: loop header
LB: loop body
LE: loop exit
PB: predicated region body
PF: predicated region fallthrough
CT: control target
= control target key end

     0   :  { %s738_s9 = smov 0   ;;  %s740_s10 = smov 0   ;;  %s836_s0 = inlined_call_operand.vmem [shape: f32[10,10], index: 0, kind: input, shape index: {}]   ;;  %s837_s1 = inlined_call_operand.vmem [shape: f32[2,10,1024], index: 1, kind: input, shape index: {}]   ;;  %s838_s2 = inlined_call_operand.vmem [shape: f32[2,10,1024], index: 2, kind: output, shape index: {}]  }
   0x1   :  { %s742_s11 = smov 0  }
   0x2 LB: > { %s24_s12 = sadd.s32 1, %s716_s10  ;;  %p648_p0 = scmp.ge.s32.totalorder %s720_s11, 1  ;;  %s720_s11 = sphi %s742_s11, %s12_s11   ;;  %s716_s10 = sphi %s740_s10, %s840_s10   ;;  %s712_s9 = sphi %s738_s9, %s839_s9  }
   0x3   : > { %p26_p1 = scmp.ge.s32.totalorder %s24_s12, 2  ;;  %p133_p2 = scmp.lt.s32.totalorder %s720_s11, 3 }
   0x5   : > { %s842_s12 = smov (%p26_p1, %s24_s12), 0  ;;  %p134_p3 = pnand %p648_p0, %p133_p2 }
   0x6   : > { %p164_p4 = scmp.lt.s32.totalorder (!%p134_p3), %s712_s9, 1 }
   0x7   : > { %137 = sbr.rel (%p134_p3) target bundleno = 228 (0xe4), region = 28 }
   0xc   : > { %v722_v0 = vmov 0.0   ;;  %s844_s9 = smov (!%p164_p4, %s712_s9), 1  ;;  %vm208_vm0 = vcmask 1041408   ;;  %v183_v9 = vld [vmem:[%s836_s0] sm:$0xff]  ;;  %vm201_vm1 = vcmask 80896  }
   0xd   : > { %297 = vmatprep.mubr.f32.mxu0 %v722_v0  ;;  %374 = vmatprep.mubr.f32.mxu1 %v722_v0  ;;  %s671_s13 = sshll.u32 %s844_s9, 7  ;;  %v184_v14 = vld [vmem:[%s836_s0 + $0x8] sm:$0x3] }
   0xe   : > { %s764_s16 = scalar_lea.vmem %s837_s1, %s671_s13  ;;  %s809_s23 = scalar_lea.vmem %s838_s2, %s671_s13 }
   0xf   : > { %v194_v1 = vld [vmem:[%s764_s16 + $0x48] sm:$0x3]  ;;  %v196_v2 = vld [vmem:[%s764_s16 + $0x58] sm:$0x3]  ;;  %v193_v3 = vld [vmem:[%s764_s16 + $0x40] sm:$0x3] }
  0x10   : > { %653 = vmatprep.subr.msk.mxu0 %vm208_vm0, %v194_v1  ;;  %657 = vmatprep.subr.msk.mxu1 %vm208_vm0, %v196_v2  ;;  %v195_v4 = vld [vmem:[%s764_s16 + $0x50] sm:$0x3]  ;;  %v186_v5 = vld [vmem:[%s764_s16 + $0x8] sm:$0xff]  ;;  %v188_v6 = vld [vmem:[%s764_s16 + $0x18] sm:$0xff] }
  0x11   : > { %654 = vmatpush1.msk.msra.mxu0 %vm208_vm0, %v193_v3  ;;  %658 = vmatpush1.msk.msra.mxu1 %vm208_vm0, %v195_v4  ;;  %v185_v7 = vld [vmem:[%s764_s16] sm:$0xff]  ;;  %v187_v8 = vld [vmem:[%s764_s16 + $0x10] sm:$0xff]  ;;  %v198_v10 = vld [vmem:[%s764_s16 + $0x68] sm:$0x3] }
  0x12   : > { %263 = vmatprep.subr.mxu0 %v186_v5  ;;  %340 = vmatprep.subr.mxu1 %v188_v6  ;;  %v200_v11 = vld [vmem:[%s764_s16 + $0x78] sm:$0x3]  ;;  %v197_v12 = vld [vmem:[%s764_s16 + $0x60] sm:$0x3]  ;;  %v199_v13 = vld [vmem:[%s764_s16 + $0x70] sm:$0x3] }
  0x13   : > { %264 = vmatpush1.msra.mxu0 %v185_v7  ;;  %341 = vmatpush1.msra.mxu1 %v187_v8  ;;  %v190_v15 = vld [vmem:[%s764_s16 + $0x28] sm:$0xff]  ;;  %v192_v16 = vld [vmem:[%s764_s16 + $0x38] sm:$0xff]  ;;  %v189_v17 = vld [vmem:[%s764_s16 + $0x20] sm:$0xff] }
  0x14   : > { %655 = vmatmul.mubr.msk.f32.vlgmr.msra.gmra.mxu0 %vm201_vm1, %v183_v9  ;;  %659 = vmatmul.mubr.msk.f32.vlgmr.msra.gmra.mxu1 %vm201_vm1, %v183_v9  ;;  %v191_v18 = vld [vmem:[%s764_s16 + $0x30] sm:$0xff] }
  0x15   : > { %661 = vmatprep.subr.msk.mxu0 %vm208_vm0, %v198_v10  ;;  %665 = vmatprep.subr.msk.mxu1 %vm208_vm0, %v200_v11 }
  0x16   : > { %662 = vmatpush1.msk.msra.mxu0 %vm208_vm0, %v197_v12  ;;  %666 = vmatpush1.msk.msra.mxu1 %vm208_vm0, %v199_v13 }
  0x17   : > { %303 = vmatprep.mubr.f32.mxu0 %v722_v0  ;;  %380 = vmatprep.mubr.f32.mxu1 %v722_v0 }
  0x18   : > { %656 = vmatmul.mubr.msk.f32.gmra.mxu0 %vm201_vm1, %v184_v14  ;;  %660 = vmatmul.mubr.msk.f32.gmra.mxu1 %vm201_vm1, %v184_v14 }
  0x19   : > { %417 = vmatprep.subr.mxu0 %v190_v15  ;;  %494 = vmatprep.subr.mxu1 %v192_v16 }
  0x1a   : > { %418 = vmatpush1.msra.mxu0 %v189_v17  ;;  %495 = vmatpush1.msra.mxu1 %v191_v18 }
  0x1b   : > { %451 = vmatprep.mubr.f32.mxu0 %v722_v0  ;;  %528 = vmatprep.mubr.f32.mxu1 %v722_v0 }
  0x1c   : > { %663 = vmatmul.mubr.msk.f32.vlgmr.msra.gmra.mxu0 %vm201_vm1, %v183_v9  ;;  %667 = vmatmul.mubr.msk.f32.vlgmr.msra.gmra.mxu1 %vm201_vm1, %v183_v9 }
  0x1d   : > { %457 = vmatprep.mubr.f32.mxu0 %v722_v0  ;;  %534 = vmatprep.mubr.f32.mxu1 %v722_v0 }
  0x20   : > { %664 = vmatmul.mubr.msk.f32.gmra.mxu0 %vm201_vm1, %v184_v14  ;;  %668 = vmatmul.mubr.msk.f32.gmra.mxu1 %vm201_vm1, %v184_v14 }
  0xd4   : > { %v299_v19 = vpop.f32.mrf.mxu0  ;;  %v376_v20 = vpop.f32.mrf.mxu1 }
  0xd5   : > { %541 = vst [vmem:[%s809_s23] sm:$0xff] %v299_v19  ;;  %543 = vst [vmem:[%s809_s23 + $0x10] sm:$0xff] %v376_v20 }
  0xd6   : > { %v301_v21 = vpop.f32.mrf.mxu0  ;;  %v378_v22 = vpop.f32.mrf.mxu1 }
  0xd7   : > { %542 = vst [vmem:[%s809_s23 + $0x8] sm:$0xff] %v301_v21  ;;  %544 = vst [vmem:[%s809_s23 + $0x18] sm:$0xff] %v378_v22 }
  0xd8   : > { %v305_v23 = vpop.f32.mrf.mxu0  ;;  %v382_v24 = vpop.f32.mrf.mxu1 }
  0xd9   : > { %549 = vst [vmem:[%s809_s23 + $0x40] sm:$0x3] %v305_v23  ;;  %551 = vst [vmem:[%s809_s23 + $0x50] sm:$0x3] %v382_v24 }
  0xda   : > { %v307_v25 = vpop.f32.mrf.mxu0  ;;  %v384_v26 = vpop.f32.mrf.mxu1 }
  0xdb   : > { %550 = vst [vmem:[%s809_s23 + $0x48] sm:$0x3] %v307_v25  ;;  %552 = vst [vmem:[%s809_s23 + $0x58] sm:$0x3] %v384_v26 }
  0xdc   : > { %v453_v27 = vpop.f32.mrf.mxu0  ;;  %v530_v28 = vpop.f32.mrf.mxu1 }
  0xdd   : > { %545 = vst [vmem:[%s809_s23 + $0x20] sm:$0xff] %v453_v27  ;;  %547 = vst [vmem:[%s809_s23 + $0x30] sm:$0xff] %v530_v28 }
  0xde   : > { %v455_v29 = vpop.f32.mrf.mxu0  ;;  %v532_v30 = vpop.f32.mrf.mxu1 }
  0xdf   : > { %546 = vst [vmem:[%s809_s23 + $0x28] sm:$0xff] %v455_v29  ;;  %548 = vst [vmem:[%s809_s23 + $0x38] sm:$0xff] %v532_v30 }
  0xe0   : > { %v459_v31 = vpop.f32.mrf.mxu0  ;;  %v536_v32 = vpop.f32.mrf.mxu1 }
  0xe1   : > { %553 = vst [vmem:[%s809_s23 + $0x60] sm:$0x3] %v459_v31  ;;  %555 = vst [vmem:[%s809_s23 + $0x70] sm:$0x3] %v536_v32 }
  0xe2   : > { %v461_v33 = vpop.f32.mrf.mxu0  ;;  %v538_v34 = vpop.f32.mrf.mxu1 }
  0xe3   : > { %554 = vst [vmem:[%s809_s23 + $0x68] sm:$0x3] %v461_v33  ;;  %556 = vst [vmem:[%s809_s23 + $0x78] sm:$0x3] %v538_v34 }
  0xe4 PF: > { %s12_s11 = sadd.s32 1, %s720_s11   ;;  %s839_s9 = smov %s716_s10 }
  0xe5   : > { %p9_p5 = scmp.ge.s32.totalorder %s12_s11, 4   ;;  %s840_s10 = smov %s842_s12 }
  0xe7   :  { %11 = sbr.rel (!%p9_p5) target bundleno = 2 (0x2), region = 58 }

</bundles_post_ra>
